<compile_context>
chip_gen: v7x
topology: tpu7x:2x2x1
jax: 0.10.0
libtpu: 0.0.40
codegen_flags: <defaults>
</compile_context>

<pallas_src>
import functools
import math

import jax
import jax.numpy as jnp
from jax.experimental import pallas as pl
from jax.experimental.pallas import tpu as pltpu

LN_EPS = 1e-5  # torch.nn.LayerNorm default


def actor_mlp_kernel(x_ref, w1_ref, b1_ref, g_ref, be_ref,
                     w2_ref, b2_ref, w3_ref, b3_ref,
                     wo_ref, bo_ref, out_ref, *, n_heads):
    # Transposed layout: activations are (features, tile_b); batch on the 128-lane axis.
    # MXU matmuls accumulate in f32; all VPU math (LN / ReLU / softmax) stays f32.
    def mm(w_ref, a):
        return jnp.dot(w_ref[...], a.astype(w_ref.dtype),
                       preferred_element_type=jnp.float32)

    x = x_ref[...].astype(jnp.float32)                      # (in_dim, tile_b)

    # trunk: Linear -> LayerNorm -> ReLU -> Linear -> ReLU -> Linear -> ReLU
    h = mm(w1_ref, x) + b1_ref[...]                         # (hidden, tile_b)
    mean = jnp.mean(h, axis=0, keepdims=True)
    var = jnp.mean((h - mean) * (h - mean), axis=0, keepdims=True)  # biased (torch LN)
    h = (h - mean) * jax.lax.rsqrt(var + LN_EPS) * g_ref[...] + be_ref[...]
    h = jnp.maximum(h, 0.0)
    h = jnp.maximum(mm(w2_ref, h) + b2_ref[...], 0.0)
    h = jnp.maximum(mm(w3_ref, h) + b3_ref[...], 0.0)

    # all heads in one fused MXU pass: (n_heads*out_dim, hidden) @ (hidden, tile_b)
    logits = mm(wo_ref, h) + bo_ref[...]                    # (fused_out, tile_b)

    # segmented softmax per head over the sublane (feature) axis, then one
    # lane-dense full-tile store.
    fused_out, tb = logits.shape
    out_dim = fused_out // n_heads
    lg = logits.reshape(n_heads, out_dim, tb)               # leading-dim split only
    m = jnp.max(lg, axis=1, keepdims=True)
    e = jnp.exp(lg - m)
    p = e / jnp.sum(e, axis=1, keepdims=True)               # exact normalization
    out_ref[...] = p.reshape(fused_out, tb).astype(out_ref.dtype)


def _round_up(x, m):
    return ((x + m - 1) // m) * m


def _choose_batch_tiling(B, max_tile_b):
    """Batch lives on the lane axis -> pad to a multiple of 128.  Large batches get
    big tiles (amortize per-step overhead); medium batches get >= 2 grid steps so
    both v7x TensorCores receive work."""
    b_pad = _round_up(max(B, 1), 128)
    if b_pad <= max_tile_b:
        tile_b = _round_up(pl.cdiv(b_pad, 2), 128) if b_pad >= 256 else b_pad
    else:
        tile_b = max_tile_b
    b_pad = _round_up(b_pad, tile_b)
    return b_pad, tile_b


def actor_mlp_forward(kernel_params, observations, state, info=None, max_tile_b=8192):
    """Mirrors ActorMLP.forward: returns (probs of shape (B, n_heads, out_dim), state)."""
    x = observations["obs"]                                  # (B, in_dim)
    B, in_dim = x.shape
    n_heads = int(kernel_params["n_heads"])
    fused_out = kernel_params["wo"].shape[0]
    out_dim = fused_out // n_heads

    b_pad, tile_b = _choose_batch_tiling(B, max_tile_b)

    # one transpose on the way in: batch -> lanes.  (Zero-padded columns are
    # harmless: LN / softmax of a constant column are finite and get sliced off.)
    x_t = jnp.transpose(x)                                   # (in_dim, B)
    if b_pad != B:
        x_t = jnp.pad(x_t, ((0, 0), (0, b_pad - B)))

    weight_args = (kernel_params["w1"], kernel_params["b1"],
                   kernel_params["ln_g"], kernel_params["ln_b"],
                   kernel_params["w2"], kernel_params["b2"],
                   kernel_params["w3"], kernel_params["b3"],
                   kernel_params["wo"], kernel_params["bo"])

    out_t = pl.pallas_call(
        functools.partial(actor_mlp_kernel, n_heads=n_heads),
        out_shape=jax.ShapeDtypeStruct((fused_out, b_pad), jnp.float32),
        grid_spec=pltpu.PrefetchScalarGridSpec(
            num_scalar_prefetch=0,
            grid=(b_pad // tile_b,),
            in_specs=[pl.BlockSpec((in_dim, tile_b), lambda i: (0, i))]
                     + [pl.BlockSpec(w.shape, lambda i: (0, 0)) for w in weight_args],
            out_specs=pl.BlockSpec((fused_out, tile_b), lambda i: (0, i)),
        ),
        compiler_params=pltpu.CompilerParams(
            dimension_semantics=("parallel",),
            vmem_limit_bytes=32 * 1024 * 1024,
        ),
    )(x_t, *weight_args)

    out = jnp.transpose(out_t[:, :B]).reshape(B, n_heads, out_dim)
    return out, state


# ----------------------- deterministic parameter init -----------------------

def _linear_init(key, fan_in, fan_out):
    """PyTorch nn.Linear default init, stored as (fan_in, fan_out) master params."""
    kw, kb = jax.random.split(key)
    bound = 1.0 / math.sqrt(fan_in)
    w = jax.random.uniform(kw, (fan_in, fan_out), jnp.float32, -bound, bound)
    b = jax.random.uniform(kb, (1, fan_out), jnp.float32, -bound, bound)
    return w, b


def make_params(key, input_dim, output_dims, hidden_dim):
    """Float32 master parameters (mirror the torch module)."""
    assert len(set(output_dims)) == 1, "torch.cat(dim=1) requires equal output_dims"
    out_dim = output_dims[0]
    n_heads = len(output_dims)
    keys = jax.random.split(key, 3 + n_heads)

    w1, b1 = _linear_init(keys[0], input_dim, hidden_dim)
    w2, b2 = _linear_init(keys[1], hidden_dim, hidden_dim)
    w3, b3 = _linear_init(keys[2], hidden_dim, hidden_dim)

    wo_list, bo_list = [], []
    for i in range(n_heads):
        w, b = _linear_init(keys[3 + i], hidden_dim, out_dim)
        wo_list.append(w)
        bo_list.append(b)

    return {
        "w1": w1, "b1": b1,
        "ln_g": jnp.ones((1, hidden_dim), jnp.float32),   # LayerNorm weight init = 1
        "ln_b": jnp.zeros((1, hidden_dim), jnp.float32),  # LayerNorm bias init = 0
        "w2": w2, "b2": b2,
        "w3": w3, "b3": b3,
        "wo": jnp.stack(wo_list, axis=0),                 # (n_heads, hidden, out_dim)
        "bo": jnp.stack(bo_list, axis=0),                 # (n_heads, 1, out_dim)
    }


def prepare_kernel_params(params, matmul_dtype=jnp.float32):
    """Transpose weights for the (features, batch) kernel layout, fuse the per-head
    projections into one (n_heads*out_dim, hidden) matrix.  matmul_dtype=f32 by
    default (recommended, esp. v5e); bf16 is an opt-in for v6e/v7x."""
    n_heads, hidden, out_dim = params["wo"].shape
    wo_fused = jnp.transpose(params["wo"], (0, 2, 1)).reshape(n_heads * out_dim, hidden)
    bo_fused = params["bo"].reshape(n_heads * out_dim, 1)
    return {
        "n_heads": n_heads,
        "w1": params["w1"].T.astype(matmul_dtype),   # (hidden, in_dim)
        "b1": params["b1"].T,                        # (hidden, 1), f32
        "ln_g": params["ln_g"].T,                    # (hidden, 1), f32
        "ln_b": params["ln_b"].T,                    # (hidden, 1), f32
        "w2": params["w2"].T.astype(matmul_dtype),
        "b2": params["b2"].T,
        "w3": params["w3"].T.astype(matmul_dtype),
        "b3": params["b3"].T,
        "wo": wo_fused.astype(matmul_dtype),         # (n_heads*out_dim, hidden)
        "bo": bo_fused,                              # (n_heads*out_dim, 1), f32
    }


# ------------------------------ pure-JAX reference ---------------------------

def actor_mlp_reference(params, x):
    h = x @ params["w1"] + params["b1"]
    mean = jnp.mean(h, axis=-1, keepdims=True)
    var = jnp.mean((h - mean) ** 2, axis=-1, keepdims=True)
    h = (h - mean) / jnp.sqrt(var + LN_EPS) * params["ln_g"] + params["ln_b"]
    h = jax.nn.relu(h)
    h = jax.nn.relu(h @ params["w2"] + params["b2"])
    h = jax.nn.relu(h @ params["w3"] + params["b3"])
    outs = []
    for i in range(params["wo"].shape[0]):
        logits = h @ params["wo"][i] + params["bo"][i]
        outs.append(jax.nn.softmax(logits, axis=-1)[:, None, :])
    return jnp.concatenate(outs, axis=1)


if __name__ == "__main__":
    B, INPUT_DIM, HIDDEN_DIM = 8, 16, 32
    OUTPUT_DIMS = (8, 8)

    root = jax.random.PRNGKey(0)
    k_params, k_obs = jax.random.split(root)

    params = make_params(k_params, INPUT_DIM, OUTPUT_DIMS, HIDDEN_DIM)
    kparams = prepare_kernel_params(params)          # f32 matmuls (exact path)
    obs = jax.random.normal(k_obs, (B, INPUT_DIM), jnp.float32)
    observations = {"obs": obs}
    state = None

    out, new_state = actor_mlp_forward(kparams, observations, state)
    out = jax.block_until_ready(out)

    ref = actor_mlp_reference(params, obs)
    assert out.shape == (B, len(OUTPUT_DIMS), OUTPUT_DIMS[0])
    assert jnp.allclose(out, ref, atol=1e-4, rtol=0.0), "mismatch vs reference"
    # each head's softmax sums to 1 (exact divide -> tight tolerance)
    assert jnp.allclose(jnp.sum(out, axis=-1), 1.0, atol=1e-5)

    print("KERNEL_OK")
</pallas_src>

<mosaic_0001>
module attributes {stable_mosaic.version = 11 : i64} {
  func.func @actor_mlp_kernel(%arg0: i32, %arg1: memref<16x128xf32, #tpu.memory_space<vmem>>, %arg2: memref<32x16xf32, #tpu.memory_space<vmem>>, %arg3: memref<32x1xf32, #tpu.memory_space<vmem>>, %arg4: memref<32x1xf32, #tpu.memory_space<vmem>>, %arg5: memref<32x1xf32, #tpu.memory_space<vmem>>, %arg6: memref<32x32xf32, #tpu.memory_space<vmem>>, %arg7: memref<32x1xf32, #tpu.memory_space<vmem>>, %arg8: memref<32x32xf32, #tpu.memory_space<vmem>>, %arg9: memref<32x1xf32, #tpu.memory_space<vmem>>, %arg10: memref<16x32xf32, #tpu.memory_space<vmem>>, %arg11: memref<16x1xf32, #tpu.memory_space<vmem>>, %arg12: memref<16x128xf32, #tpu.memory_space<vmem>>) attributes {dimension_semantics = [#tpu.dimension_semantics<parallel>], iteration_bounds = array<i64: 1>, scalar_prefetch = 0 : i64, scratch_operands = 0 : i64, tpu.core_type = #tpu.core_type<tc>, window_params = [{transform_indices = @transform_0, window_bounds = array<i64: 16, 128>}, {pipeline_mode = #tpu.pipeline_mode<synchronous>, transform_indices = @transform_1, window_bounds = array<i64: 32, 16>}, {pipeline_mode = #tpu.pipeline_mode<synchronous>, transform_indices = @transform_2, window_bounds = array<i64: 32, 1>}, {pipeline_mode = #tpu.pipeline_mode<synchronous>, transform_indices = @transform_3, window_bounds = array<i64: 32, 1>}, {pipeline_mode = #tpu.pipeline_mode<synchronous>, transform_indices = @transform_4, window_bounds = array<i64: 32, 1>}, {pipeline_mode = #tpu.pipeline_mode<synchronous>, transform_indices = @transform_5, window_bounds = array<i64: 32, 32>}, {pipeline_mode = #tpu.pipeline_mode<synchronous>, transform_indices = @transform_6, window_bounds = array<i64: 32, 1>}, {pipeline_mode = #tpu.pipeline_mode<synchronous>, transform_indices = @transform_7, window_bounds = array<i64: 32, 32>}, {pipeline_mode = #tpu.pipeline_mode<synchronous>, transform_indices = @transform_8, window_bounds = array<i64: 32, 1>}, {pipeline_mode = #tpu.pipeline_mode<synchronous>, transform_indices = @transform_9, window_bounds = array<i64: 16, 32>}, {pipeline_mode = #tpu.pipeline_mode<synchronous>, transform_indices = @transform_10, window_bounds = array<i64: 16, 1>}, {transform_indices = @transform_11, window_bounds = array<i64: 16, 128>}]} {
    %c0 = arith.constant 0 : index
    %c0_0 = arith.constant 0 : index
    %0 = vector.load %arg1[%c0, %c0_0] : memref<16x128xf32, #tpu.memory_space<vmem>>, vector<16x128xf32>
    %c0_1 = arith.constant 0 : index
    %c0_2 = arith.constant 0 : index
    %1 = vector.load %arg2[%c0_1, %c0_2] : memref<32x16xf32, #tpu.memory_space<vmem>>, vector<32x16xf32>
    %cst = arith.constant dense<0.000000e+00> : vector<32x128xf32>
    %2 = tpu.matmul %1, %0, %cst {dimension_numbers = #tpu.dot_dimension_numbers<[1], [0], [0], [1], [0, 0, 1, 1], [], []>} : vector<32x16xf32>, vector<16x128xf32>, vector<32x128xf32> -> vector<32x128xf32>
    %c0_3 = arith.constant 0 : index
    %c0_4 = arith.constant 0 : index
    %3 = vector.load %arg3[%c0_3, %c0_4] : memref<32x1xf32, #tpu.memory_space<vmem>>, vector<32x1xf32>
    %4 = vector.broadcast %3 : vector<32x1xf32> to vector<32x128xf32>
    %5 = arith.addf %2, %4 : vector<32x128xf32>
    %cst_5 = arith.constant dense<0.000000e+00> : vector<128xf32>
    %6 = vector.multi_reduction <add>, %5, %cst_5 [0] : vector<32x128xf32> to vector<128xf32>
    %7 = vector.shape_cast %6 : vector<128xf32> to vector<1x128xf32>
    %cst_6 = arith.constant 3.200000e+01 : f32
    %8 = vector.broadcast %cst_6 : f32 to vector<1x128xf32>
    %9 = arith.divf %7, %8 : vector<1x128xf32>
    %10 = vector.broadcast %9 : vector<1x128xf32> to vector<32x128xf32>
    %11 = arith.subf %5, %10 : vector<32x128xf32>
    %12 = vector.broadcast %9 : vector<1x128xf32> to vector<32x128xf32>
    %13 = arith.subf %5, %12 : vector<32x128xf32>
    %14 = arith.mulf %11, %13 : vector<32x128xf32>
    %cst_7 = arith.constant dense<0.000000e+00> : vector<128xf32>
    %15 = vector.multi_reduction <add>, %14, %cst_7 [0] : vector<32x128xf32> to vector<128xf32>
    %16 = vector.shape_cast %15 : vector<128xf32> to vector<1x128xf32>
    %cst_8 = arith.constant 3.200000e+01 : f32
    %17 = vector.broadcast %cst_8 : f32 to vector<1x128xf32>
    %18 = arith.divf %16, %17 : vector<1x128xf32>
    %19 = vector.broadcast %9 : vector<1x128xf32> to vector<32x128xf32>
    %20 = arith.subf %5, %19 : vector<32x128xf32>
    %cst_9 = arith.constant 9.99999974E-6 : f32
    %21 = vector.broadcast %cst_9 : f32 to vector<1x128xf32>
    %22 = arith.addf %18, %21 : vector<1x128xf32>
    %23 = math.rsqrt %22 : vector<1x128xf32>
    %24 = vector.broadcast %23 : vector<1x128xf32> to vector<32x128xf32>
    %25 = arith.mulf %20, %24 : vector<32x128xf32>
    %c0_10 = arith.constant 0 : index
    %c0_11 = arith.constant 0 : index
    %26 = vector.load %arg4[%c0_10, %c0_11] : memref<32x1xf32, #tpu.memory_space<vmem>>, vector<32x1xf32>
    %27 = vector.broadcast %26 : vector<32x1xf32> to vector<32x128xf32>
    %28 = arith.mulf %25, %27 : vector<32x128xf32>
    %c0_12 = arith.constant 0 : index
    %c0_13 = arith.constant 0 : index
    %29 = vector.load %arg5[%c0_12, %c0_13] : memref<32x1xf32, #tpu.memory_space<vmem>>, vector<32x1xf32>
    %30 = vector.broadcast %29 : vector<32x1xf32> to vector<32x128xf32>
    %31 = arith.addf %28, %30 : vector<32x128xf32>
    %cst_14 = arith.constant 0.000000e+00 : f32
    %32 = vector.broadcast %cst_14 : f32 to vector<32x128xf32>
    %33 = arith.maximumf %31, %32 : vector<32x128xf32>
    %c0_15 = arith.constant 0 : index
    %c0_16 = arith.constant 0 : index
    %34 = vector.load %arg6[%c0_15, %c0_16] : memref<32x32xf32, #tpu.memory_space<vmem>>, vector<32x32xf32>
    %cst_17 = arith.constant dense<0.000000e+00> : vector<32x128xf32>
    %35 = tpu.matmul %34, %33, %cst_17 {dimension_numbers = #tpu.dot_dimension_numbers<[1], [0], [0], [1], [0, 0, 1, 1], [], []>} : vector<32x32xf32>, vector<32x128xf32>, vector<32x128xf32> -> vector<32x128xf32>
    %c0_18 = arith.constant 0 : index
    %c0_19 = arith.constant 0 : index
    %36 = vector.load %arg7[%c0_18, %c0_19] : memref<32x1xf32, #tpu.memory_space<vmem>>, vector<32x1xf32>
    %37 = vector.broadcast %36 : vector<32x1xf32> to vector<32x128xf32>
    %38 = arith.addf %35, %37 : vector<32x128xf32>
    %cst_20 = arith.constant 0.000000e+00 : f32
    %39 = vector.broadcast %cst_20 : f32 to vector<32x128xf32>
    %40 = arith.maximumf %38, %39 : vector<32x128xf32>
    %c0_21 = arith.constant 0 : index
    %c0_22 = arith.constant 0 : index
    %41 = vector.load %arg8[%c0_21, %c0_22] : memref<32x32xf32, #tpu.memory_space<vmem>>, vector<32x32xf32>
    %cst_23 = arith.constant dense<0.000000e+00> : vector<32x128xf32>
    %42 = tpu.matmul %41, %40, %cst_23 {dimension_numbers = #tpu.dot_dimension_numbers<[1], [0], [0], [1], [0, 0, 1, 1], [], []>} : vector<32x32xf32>, vector<32x128xf32>, vector<32x128xf32> -> vector<32x128xf32>
    %c0_24 = arith.constant 0 : index
    %c0_25 = arith.constant 0 : index
    %43 = vector.load %arg9[%c0_24, %c0_25] : memref<32x1xf32, #tpu.memory_space<vmem>>, vector<32x1xf32>
    %44 = vector.broadcast %43 : vector<32x1xf32> to vector<32x128xf32>
    %45 = arith.addf %42, %44 : vector<32x128xf32>
    %cst_26 = arith.constant 0.000000e+00 : f32
    %46 = vector.broadcast %cst_26 : f32 to vector<32x128xf32>
    %47 = arith.maximumf %45, %46 : vector<32x128xf32>
    %c0_27 = arith.constant 0 : index
    %c0_28 = arith.constant 0 : index
    %48 = vector.load %arg10[%c0_27, %c0_28] : memref<16x32xf32, #tpu.memory_space<vmem>>, vector<16x32xf32>
    %cst_29 = arith.constant dense<0.000000e+00> : vector<16x128xf32>
    %49 = tpu.matmul %48, %47, %cst_29 {dimension_numbers = #tpu.dot_dimension_numbers<[1], [0], [0], [1], [0, 0, 1, 1], [], []>} : vector<16x32xf32>, vector<32x128xf32>, vector<16x128xf32> -> vector<16x128xf32>
    %c0_30 = arith.constant 0 : index
    %c0_31 = arith.constant 0 : index
    %50 = vector.load %arg11[%c0_30, %c0_31] : memref<16x1xf32, #tpu.memory_space<vmem>>, vector<16x1xf32>
    %51 = vector.broadcast %50 : vector<16x1xf32> to vector<16x128xf32>
    %52 = arith.addf %49, %51 : vector<16x128xf32>
    %53 = vector.shape_cast %52 : vector<16x128xf32> to vector<2x8x128xf32>
    %cst_32 = arith.constant dense<0xFF800000> : vector<2x128xf32>
    %54 = vector.multi_reduction <maximumf>, %53, %cst_32 [1] : vector<2x8x128xf32> to vector<2x128xf32>
    %55 = vector.shape_cast %54 : vector<2x128xf32> to vector<2x1x128xf32>
    %56 = vector.broadcast %55 : vector<2x1x128xf32> to vector<2x8x128xf32>
    %57 = arith.subf %53, %56 : vector<2x8x128xf32>
    %58 = math.exp %57 : vector<2x8x128xf32>
    %cst_33 = arith.constant dense<0.000000e+00> : vector<2x128xf32>
    %59 = vector.multi_reduction <add>, %58, %cst_33 [1] : vector<2x8x128xf32> to vector<2x128xf32>
    %60 = vector.shape_cast %59 : vector<2x128xf32> to vector<2x1x128xf32>
    %61 = vector.broadcast %60 : vector<2x1x128xf32> to vector<2x8x128xf32>
    %62 = arith.divf %58, %61 : vector<2x8x128xf32>
    %63 = vector.shape_cast %62 : vector<2x8x128xf32> to vector<16x128xf32>
    %c0_34 = arith.constant 0 : index
    %c0_35 = arith.constant 0 : index
    %64 = vector.load %arg12[%c0_34, %c0_35] : memref<16x128xf32, #tpu.memory_space<vmem>>, vector<16x128xf32>
    tpu.vector_store %arg12[%c0_34, %c0_35], %63 {strides = array<i32>} : memref<16x128xf32, #tpu.memory_space<vmem>>, vector<16x128xf32>,
    return
  }
  func.func @transform_0(%arg0: i32) -> (i32, i32) {
    %c0_i32 = arith.constant 0 : i32
    %c0_i32_0 = arith.constant 0 : i32
    return %c0_i32, %arg0 : i32, i32
  }
  func.func @transform_1(%arg0: i32) -> (i32, i32) {
    %c0_i32 = arith.constant 0 : i32
    %c0_i32_0 = arith.constant 0 : i32
    %c0_i32_1 = arith.constant 0 : i32
    return %c0_i32, %c0_i32_0 : i32, i32
  }
  func.func @transform_2(%arg0: i32) -> (i32, i32) {
    %c0_i32 = arith.constant 0 : i32
    %c0_i32_0 = arith.constant 0 : i32
    %c0_i32_1 = arith.constant 0 : i32
    return %c0_i32, %c0_i32_0 : i32, i32
  }
  func.func @transform_3(%arg0: i32) -> (i32, i32) {
    %c0_i32 = arith.constant 0 : i32
    %c0_i32_0 = arith.constant 0 : i32
    %c0_i32_1 = arith.constant 0 : i32
    return %c0_i32, %c0_i32_0 : i32, i32
  }
  func.func @transform_4(%arg0: i32) -> (i32, i32) {
    %c0_i32 = arith.constant 0 : i32
    %c0_i32_0 = arith.constant 0 : i32
    %c0_i32_1 = arith.constant 0 : i32
    return %c0_i32, %c0_i32_0 : i32, i32
  }
  func.func @transform_5(%arg0: i32) -> (i32, i32) {
    %c0_i32 = arith.constant 0 : i32
    %c0_i32_0 = arith.constant 0 : i32
    %c0_i32_1 = arith.constant 0 : i32
    return %c0_i32, %c0_i32_0 : i32, i32
  }
  func.func @transform_6(%arg0: i32) -> (i32, i32) {
    %c0_i32 = arith.constant 0 : i32
    %c0_i32_0 = arith.constant 0 : i32
    %c0_i32_1 = arith.constant 0 : i32
    return %c0_i32, %c0_i32_0 : i32, i32
  }
  func.func @transform_7(%arg0: i32) -> (i32, i32) {
    %c0_i32 = arith.constant 0 : i32
    %c0_i32_0 = arith.constant 0 : i32
    %c0_i32_1 = arith.constant 0 : i32
    return %c0_i32, %c0_i32_0 : i32, i32
  }
  func.func @transform_8(%arg0: i32) -> (i32, i32) {
    %c0_i32 = arith.constant 0 : i32
    %c0_i32_0 = arith.constant 0 : i32
    %c0_i32_1 = arith.constant 0 : i32
    return %c0_i32, %c0_i32_0 : i32, i32
  }
  func.func @transform_9(%arg0: i32) -> (i32, i32) {
    %c0_i32 = arith.constant 0 : i32
    %c0_i32_0 = arith.constant 0 : i32
    %c0_i32_1 = arith.constant 0 : i32
    return %c0_i32, %c0_i32_0 : i32, i32
  }
  func.func @transform_10(%arg0: i32) -> (i32, i32) {
    %c0_i32 = arith.constant 0 : i32
    %c0_i32_0 = arith.constant 0 : i32
    %c0_i32_1 = arith.constant 0 : i32
    return %c0_i32, %c0_i32_0 : i32, i32
  }
  func.func @transform_11(%arg0: i32) -> (i32, i32) {
    %c0_i32 = arith.constant 0 : i32
    %c0_i32_0 = arith.constant 0 : i32
    return %c0_i32, %arg0 : i32, i32
  }
}

</mosaic_0001>

<bundles_post_ra>
// kernel: tpu_custom_call.1
= control target key start
LH: loop header
LB: loop body
LE: loop exit
PB: predicated region body
PF: predicated region fallthrough
CT: control target
= control target key end

     0   :  { %vm69_vm0 = vcmask 130048   ;;  %v827_v4 = vmov 0   ;;  %s1031_s0 = inlined_call_operand.vmem [shape: f32[16,128], index: 0, kind: input, shape index: {}]   ;;  %s1032_s1 = inlined_call_operand.vmem [shape: f32[32,16], index: 1, kind: input, shape index: {}]   ;;  %s1033_s2 = inlined_call_operand.vmem [shape: f32[32,1], index: 2, kind: input, shape index: {}]   ;;  %s1034_s3 = inlined_call_operand.vmem [shape: f32[32,1], index: 3, kind: input, shape index: {}]   ;;  %s1035_s4 = inlined_call_operand.vmem [shape: f32[32,1], index: 4, kind: input, shape index: {}]   ;;  %s1036_s5 = inlined_call_operand.vmem [shape: f32[32,32], index: 5, kind: input, shape index: {}]   ;;  %s1037_s6 = inlined_call_operand.vmem [shape: f32[32,1], index: 6, kind: input, shape index: {}]   ;;  %s1038_s7 = inlined_call_operand.vmem [shape: f32[32,32], index: 7, kind: input, shape index: {}]   ;;  %s1039_s8 = inlined_call_operand.vmem [shape: f32[32,1], index: 8, kind: input, shape index: {}]   ;;  %s1040_s9 = inlined_call_operand.vmem [shape: f32[16,32], index: 9, kind: input, shape index: {}]   ;;  %s1041_s10 = inlined_call_operand.vmem [shape: f32[16,1], index: 10, kind: input, shape index: {}]   ;;  %s1042_s11 = inlined_call_operand.hbm [shape: f32[16,128], index: 11, kind: output, shape index: {}]  }
   0x1   :  { %v39_v0 = vld [vmem:[%s1031_s0] sm:$0xff]  ;;  %v40_v1 = vld [vmem:[%s1031_s0 + $0x8] sm:$0xff]  ;;  %791 = vset.pattern.permute.xlu0 %v827_v4  ;;  %792 = vset.pattern.permute.xlu1 %v827_v4  ;;  %v47_v6 = vld [vmem:[%s1033_s2 + $0x10] sm:$0xff] }
   0x2   :  { %v41_v2 = vld [vmem:[%s1032_s1] sm:$0xff]  ;;  %v759_v3 = vpack.c.bf16 %v40_v1, %v39_v0  ;;  %v42_v7 = vld [vmem:[%s1032_s1 + $0x8] sm:$0xff]  ;;  %61 = vperm.xlu1 %792, %v47_v6   ;;  %v43_v9 = vld [vmem:[%s1032_s1 + $0x10] sm:$0xff] }
   0x3   :  { %714 = vmatprep.mubr.msk.f32.mxu0 %vm69_vm0, %v41_v2  ;;  %v45_v5 = vld [vmem:[%s1033_s2] sm:$0xff]  ;;  %v46_v8 = vld [vmem:[%s1033_s2 + $0x8] sm:$0xff]  ;;  %v48_v10 = vld [vmem:[%s1033_s2 + $0x18] sm:$0xff] }
   0x4   :  { %760 = vmatprep.subr.bf16.mxu0 %v759_v3  ;;  %51 = vperm.xlu0 %791, %v45_v5   ;;  %v44_v11 = vld [vmem:[%s1032_s1 + $0x18] sm:$0xff]  ;;  %v202_v12 = vld [vmem:[%s1034_s3] sm:$0xff]  ;;  %v203_v13 = vld [vmem:[%s1034_s3 + $0x8] sm:$0xff] }
   0x5   :  { %762 = vmatpush3.bf16.msra.mxu0 %v759_v3 }
   0x6   :  { %66 = vperm.xlu1 %792, %v48_v10  }
   0x8   :  { %715 = vmatmul.mubr.msk.f32.vlgmr.msra.gmra.mrb[0].mxu0 %vm69_vm0, %v42_v7  ;;  %56 = vperm.xlu0 %791, %v46_v8  }
   0x9   :  { %717 = vmatprep.mubr.msk.f32.mxu0 %vm69_vm0, %v43_v9 }
   0xa   :  { %16 = vsyncpa [#allocation3], 0  ;;  %213 = vperm.xlu1 %792, %v203_v13   ;;  %v230_v14 = vld [vmem:[%s1035_s4] sm:$0xff]  ;;  %v231_v15 = vld [vmem:[%s1035_s4 + $0x8] sm:$0xff]  ;;  %vm290_vm1 = vcmask 261120  }
   0xb   :  { %v204_v16 = vld [vmem:[%s1034_s3 + $0x10] sm:$0xff]  ;;  %v205_v17 = vld [vmem:[%s1034_s3 + $0x18] sm:$0xff]  ;;  %v266_v20 = vld [vmem:[%s1037_s6] sm:$0xff] }
   0xc   :  { %718 = vmatmul.mubr.msk.f32.gmra.mrb[2].mxu0 %vm69_vm0, %v44_v11  ;;  %208 = vperm.xlu0 %791, %v202_v12   ;;  %v232_v18 = vld [vmem:[%s1035_s4 + $0x10] sm:$0xff]  ;;  %v233_v19 = vld [vmem:[%s1035_s4 + $0x18] sm:$0xff]  ;;  %v267_v21 = vld [vmem:[%s1037_s6 + $0x8] sm:$0xff] }
   0xd   :  { %v268_v22 = vld [vmem:[%s1037_s6 + $0x10] sm:$0xff]  ;;  %v269_v23 = vld [vmem:[%s1037_s6 + $0x18] sm:$0xff]  ;;  %v396_v24 = vld [vmem:[%s1039_s8] sm:$0xff] }
   0xe   :  { %241 = vperm.xlu1 %792, %v231_v15   ;;  %v397_v25 = vld [vmem:[%s1039_s8 + $0x8] sm:$0xff]  ;;  %v398_v26 = vld [vmem:[%s1039_s8 + $0x10] sm:$0xff]  ;;  %v399_v27 = vld [vmem:[%s1039_s8 + $0x18] sm:$0xff] }
   0xf   :  { %v523_v28 = vld [vmem:[%s1041_s10] sm:$0xff]  ;;  %v524_v29 = vld [vmem:[%s1041_s10 + $0x8] sm:$0xff] }
  0x10   :  { %236 = vperm.xlu0 %791, %v230_v14   ;;  %v262_v30 = vld [vmem:[%s1036_s5] sm:$0xff] }
  0x11   :  { %728 = vmatprep.mubr.msk.f32.mxu1 %vm290_vm1, %v262_v30 }
  0x12   :  { %223 = vperm.xlu1 %792, %v205_v17  }
  0x14   :  { %218 = vperm.xlu0 %791, %v204_v16  }
  0x16   :  { %251 = vperm.xlu1 %792, %v233_v19  }
  0x18   :  { %246 = vperm.xlu0 %791, %v232_v18  }
  0x1a   :  { %277 = vperm.xlu1 %792, %v267_v21  }
  0x1c   :  { %272 = vperm.xlu0 %791, %v266_v20  }
  0x1e   :  { %287 = vperm.xlu1 %792, %v269_v23  }
  0x20   :  { %282 = vperm.xlu0 %791, %v268_v22  }
  0x22   :  { %407 = vperm.xlu1 %792, %v397_v25  }
  0x24   :  { %402 = vperm.xlu0 %791, %v396_v24  }
  0x26   :  { %417 = vperm.xlu1 %792, %v399_v27  }
  0x28   :  { %412 = vperm.xlu0 %791, %v398_v26  }
  0x2a   :  { %532 = vperm.xlu1 %792, %v524_v29  }
  0x2c   :  { %527 = vperm.xlu0 %791, %v523_v28  }
  0x81   :  { %v62_v34 = vpop.permute.xlu1 %61 }
  0x83   :  { %v52_v31 = vpop.permute.xlu0 %51 }
  0x85   :  { %v67_v42 = vpop.permute.xlu1 %66 }
  0x87   :  { %v57_v32 = vpop.permute.xlu0 %56 }
  0x89   :  { %v214_v7 = vpop.permute.xlu1 %213 }
  0x8b   :  { %v209_v6 = vpop.permute.xlu0 %208 }
  0x8d   :  { %v242_v11 = vpop.permute.xlu1 %241 }
  0x8f   :  { %v237_v10 = vpop.permute.xlu0 %236 }
  0x91   :  { %v224_v13 = vpop.permute.xlu1 %223 }
  0x93   :  { %v219_v12 = vpop.permute.xlu0 %218 }
  0x95   :  { %v252_v24 = vpop.permute.xlu1 %251 }
  0x97   :  { %v247_v23 = vpop.permute.xlu0 %246 }
  0xdb   :  { %v716_v33 = vpop.f32.mrb[0].mxu0 }
  0xdc   :  { %v154_v35 = vadd.f32 %v716_v33, %v57_v32  ;;  %v148_v36 = vpop.f32.mrb[1].mxu0 }
  0xdd   :  { %v149_v37 = vadd.f32 %v148_v36, %v52_v31  ;;  %v264_v36 = vld [vmem:[%s1036_s5 + $0x10] sm:$0xff] }
  0xdf   :  { %v167_v38 = vadd.f32 %v154_v35, %v149_v37  ;;  %v719_v39 = vpop.f32.mrb[2].mxu0 }
  0xe0   :  { %v158_v40 = vpop.f32.mrb[3].mxu0  ;;  %v164_v43 = vadd.f32 %v719_v39, %v67_v42  ;;  %v278_v39 = vpop.permute.xlu1 %277 }
  0xe1   :  { %v159_v41 = vadd.f32 %v158_v40, %v62_v34  ;;  %v273_v40 = vpop.permute.xlu0 %272 }
  0xe3   :  { %v168_v44 = vadd.f32 %v167_v38, %v159_v41  ;;  %v392_v38 = vld [vmem:[%s1038_s7] sm:$0xff] }
  0xe4   :  { %742 = vmatprep.mubr.msk.f32.mxu0 %vm290_vm1, %v392_v38 }
  0xe5   :  { %v169_v45 = vadd.f32 %v168_v44, %v164_v43 }
  0xe7   :  { %v170_v46 = vrot.slane %v169_v45, 4 }
  0xe9   :  { %v171_v47 = vadd.f32 %v170_v46, %v169_v45  ;;  %v288_v46 = vpop.permute.xlu1 %287 }
  0xeb   :  { %v172_v48 = vrot.slane %v171_v47, 2 }
  0xed   :  { %v173_v49 = vadd.f32 %v172_v48, %v171_v47 }
  0xef   :  { %v174_v50 = vrot.slane %v173_v49, 1 }
  0xf1   :  { %v175_v51 = vadd.f32 %v174_v50, %v173_v49  ;;  %v283_v49 = vpop.permute.xlu0 %282 }
  0xf3   :  { %v177_v52 = vmul.f32 0.03125, %v175_v51 }
  0xf5   :  { %v178_v53 = vsub.f32 %v149_v37, %v177_v52  ;;  %v179_v54 = vsub.f32 %v154_v35, %v177_v52  ;;  %v180_v55 = vsub.f32 %v159_v41, %v177_v52  ;;  %v181_v56 = vsub.f32 %v164_v43, %v177_v52  ;;  %v263_v35 = vld [vmem:[%s1036_s5 + $0x8] sm:$0xff]  ;;  %v265_v37 = vld [vmem:[%s1036_s5 + $0x18] sm:$0xff] }
  0xf7   :  { %v182_v57 = vmul.f32 %v178_v53, %v178_v53  ;;  %v183_v58 = vmul.f32 %v179_v54, %v179_v54  ;;  %v184_v59 = vmul.f32 %v180_v55, %v180_v55  ;;  %v185_v61 = vmul.f32 %v181_v56, %v181_v56 }
  0xf9   :  { %v186_v60 = vadd.f32 %v183_v58, %v182_v57  ;;  %v393_v57 = vld [vmem:[%s1038_s7 + $0x8] sm:$0xff]  ;;  %v394_v58 = vld [vmem:[%s1038_s7 + $0x10] sm:$0xff] }
  0xfb   :  { %v187_v62 = vadd.f32 %v186_v60, %v184_v59  ;;  %v395_v59 = vld [vmem:[%s1038_s7 + $0x18] sm:$0xff]  ;;  %v521_v60 = vld [vmem:[%s1040_s9] sm:$0xff] }
  0xfd   :  { %v188_v63 = vadd.f32 %v187_v62, %v185_v61  ;;  %v408_v61 = vpop.permute.xlu1 %407  ;;  %v403_v62 = vpop.permute.xlu0 %402 }
  0xff   :  { %v189_v0 = vrot.slane %v188_v63, 4 }
 0x101   :  { %v190_v1 = vadd.f32 %v189_v0, %v188_v63 }
 0x103   :  { %v191_v2 = vrot.slane %v190_v1, 2 }
 0x105   :  { %v192_v3 = vadd.f32 %v191_v2, %v190_v1 }
 0x107   :  { %v193_v4 = vrot.slane %v192_v3, 1 }
 0x109   :  { %v194_v5 = vadd.f32 %v193_v4, %v192_v3  ;;  %v418_v4 = vpop.permute.xlu1 %417 }
 0x10b   :  { %v195_v8 = vmul.f32 0.03125, %v194_v5 }
 0x10d   :  { %v196_v9 = vadd.f32 1e-05, %v195_v8 }
 0x10f   :  { %793 = vrsqrt.f32 %v196_v9 }
 0x119   :  { %v794_v14 = vpop.eup %793 }
 0x11a   :  { %v200_v15 = vmul.f32 %v794_v14, %v180_v55  ;;  %v198_v16 = vmul.f32 %v794_v14, %v178_v53  ;;  %v199_v17 = vmul.f32 %v794_v14, %v179_v54  ;;  %v201_v18 = vmul.f32 %v794_v14, %v181_v56 }
 0x11c   :  { %v228_v19 = vmul.f32 %v219_v12, %v200_v15  ;;  %v226_v20 = vmul.f32 %v209_v6, %v198_v16  ;;  %v227_v21 = vmul.f32 %v214_v7, %v199_v17  ;;  %v229_v22 = vmul.f32 %v224_v13, %v201_v18  ;;  %v413_v7 = vpop.permute.xlu0 %412  ;;  %v522_v15 = vld [vmem:[%s1040_s9 + $0x8] sm:$0xff]  ;;  %v533_v16 = vpop.permute.xlu1 %532  ;;  %s828_s9 = smov [#allocation2]  }
 0x11d   :  { %s657_s20 = sshll.u32 %s828_s9, 4  ;;  %s658_s20 = int_to_ptr.vmem [resolvable:$true] %s657_s20 }
 0x11e   :  { %v254_v25 = vadd.f32 %v237_v10, %v226_v20  ;;  %v255_v26 = vadd.f32 %v242_v11, %v227_v21  ;;  %v256_v27 = vadd.f32 %v247_v23, %v228_v19  ;;  %v257_v28 = vadd.f32 %v252_v24, %v229_v22  ;;  %s803_s2 = scalar_lea.vmem %s658_s20, 256  ;;  %p808_p1 = scmp.lt.s32.totalorder %s658_s20, %s658_s20 }
 0x11f   :  { %p804_p0 = scmp.ne.s32.totalorder %s658_s20, %s803_s2  ;;  %p809_p2 = scmp.lt.s32.totalorder %s803_s2, %s803_s2 }
 0x120   :  { %v258_v29 = vmax.f32 %v254_v25, 0.0  ;;  %v259_v30 = vmax.f32 %v255_v26, 0.0  ;;  %v260_v31 = vmax.f32 %v256_v27, 0.0  ;;  %v261_v32 = vmax.f32 %v257_v28, 0.0  ;;  %v528_v18 = vpop.permute.xlu0 %527 }
 0x121   :  { %p810_p3 = por %p809_p2, %p808_p1 }
 0x122   :  { %v763_v33 = vpack.c.bf16 %v259_v30, %v258_v29  ;;  %v767_v34 = vpack.c.bf16 %v261_v32, %v260_v31 }
 0x123   :  { %p811_p4 = pnand %p810_p3, %p804_p0 }
 0x124   :  { %764 = vmatprep.subr.bf16.mxu1 %v763_v33 }
 0x125   :  { %766 = vmatpush3.bf16.msra.mxu1 %v763_v33 }
 0x126   :  { %768 = vmatprep.subr.bf16.mxu1 %v767_v34 }
 0x129   :  { %770 = vmatpush3.bf16.msra.mxu1 %v767_v34 }
 0x12c   :  { %729 = vmatmul.mubr.msk.f32.vlgmr.msra.gmra.mrb[0].mxu1 %vm290_vm1, %v263_v35 }
 0x12d   :  { %731 = vmatprep.mubr.msk.f32.mxu1 %vm290_vm1, %v264_v36 }
 0x130   :  { %732 = vmatmul.mubr.msk.f32.gmra.mrb[2].mxu1 %vm290_vm1, %v265_v37 }
 0x131   :  { %756 = vmatprep.mubr.msk.f32.mxu1 %vm290_vm1, %v521_v60 }
 0x1ff   :  { %v730_v41 = vpop.f32.mrb[0].mxu1 }
 0x200   :  { %v375_v42 = vadd.f32 %v730_v41, %v278_v39  ;;  %v369_v43 = vpop.f32.mrb[1].mxu1 }
 0x201   :  { %v370_v44 = vadd.f32 %v369_v43, %v273_v40 }
 0x202   :  { %v389_v45 = vmax.f32 %v375_v42, 0.0 }
 0x203   :  { %v388_v47 = vmax.f32 %v370_v44, 0.0  ;;  %v733_v48 = vpop.f32.mrb[2].mxu1 }
 0x204   :  { %v385_v50 = vadd.f32 %v733_v48, %v288_v46  ;;  %v379_v51 = vpop.f32.mrb[3].mxu1 }
 0x205   :  { %v771_v52 = vpack.c.bf16 %v389_v45, %v388_v47  ;;  %v380_v53 = vadd.f32 %v379_v51, %v283_v49 }
 0x206   :  { %v391_v54 = vmax.f32 %v385_v50, 0.0 }
 0x207   :  { %v390_v55 = vmax.f32 %v380_v53, 0.0  ;;  %772 = vmatprep.subr.bf16.mxu0 %v771_v52 }
 0x208   :  { %774 = vmatpush3.bf16.msra.mxu0 %v771_v52 }
 0x209   :  { %v775_v56 = vpack.c.bf16 %v391_v54, %v390_v55 }
 0x20b   :  { %776 = vmatprep.subr.bf16.mxu0 %v775_v56 }
 0x20c   :  { %778 = vmatpush3.bf16.msra.mxu0 %v775_v56 }
 0x20f   :  { %743 = vmatmul.mubr.msk.f32.vlgmr.msra.gmra.mrb[4].mxu0 %vm290_vm1, %v393_v57 }
 0x210   :  { %745 = vmatprep.mubr.msk.f32.mxu0 %vm290_vm1, %v394_v58 }
 0x213   :  { %746 = vmatmul.mubr.msk.f32.gmra.mrb[6].mxu0 %vm290_vm1, %v395_v59 }
 0x2e2   :  { %v744_v63 = vpop.f32.mrb[4].mxu0 }
 0x2e3   :  { %v504_v0 = vadd.f32 %v744_v63, %v408_v61  ;;  %v498_v1 = vpop.f32.mrb[5].mxu0 }
 0x2e4   :  { %v499_v2 = vadd.f32 %v498_v1, %v403_v62 }
 0x2e5   :  { %v518_v3 = vmax.f32 %v504_v0, 0.0 }
 0x2e6   :  { %v517_v5 = vmax.f32 %v499_v2, 0.0  ;;  %v747_v6 = vpop.f32.mrb[6].mxu0 }
 0x2e7   :  { %v514_v8 = vadd.f32 %v747_v6, %v418_v4  ;;  %v508_v9 = vpop.f32.mrb[7].mxu0 }
 0x2e8   :  { %v779_v10 = vpack.c.bf16 %v518_v3, %v517_v5  ;;  %v509_v11 = vadd.f32 %v508_v9, %v413_v7 }
 0x2e9   :  { %v520_v12 = vmax.f32 %v514_v8, 0.0 }
 0x2ea   :  { %v519_v13 = vmax.f32 %v509_v11, 0.0  ;;  %780 = vmatprep.subr.bf16.mxu1 %v779_v10 }
 0x2eb   :  { %782 = vmatpush3.bf16.msra.mxu1 %v779_v10 }
 0x2ec   :  { %v783_v14 = vpack.c.bf16 %v520_v12, %v519_v13 }
 0x2ee   :  { %784 = vmatprep.subr.bf16.mxu1 %v783_v14 }
 0x2ef   :  { %786 = vmatpush3.bf16.msra.mxu1 %v783_v14 }
 0x2f2   :  { %757 = vmatmul.mubr.msk.f32.vlgmr.msra.gmra.mrb[4].mxu1 %vm290_vm1, %v522_v15 }
 0x3c5   :  { %v758_v17 = vpop.f32.mrb[4].mxu1 }
 0x3c6   :  { %v613_v19 = vadd.f32 %v758_v17, %v533_v16  ;;  %v607_v20 = vpop.f32.mrb[5].mxu1 }
 0x3c7   :  { %v608_v21 = vadd.f32 %v607_v20, %v528_v18 }
 0x3c8   :  { %v622_v22 = vrot.slane %v613_v19, 4 }
 0x3c9   :  { %v616_v23 = vrot.slane %v608_v21, 4 }
 0x3ca   :  { %v623_v24 = vmax.f32 %v613_v19, %v622_v22 }
 0x3cb   :  { %v617_v25 = vmax.f32 %v608_v21, %v616_v23 }
 0x3cc   :  { %v624_v26 = vrot.slane %v623_v24, 2 }
 0x3cd   :  { %v618_v27 = vrot.slane %v617_v25, 2 }
 0x3ce   :  { %v625_v28 = vmax.f32 %v623_v24, %v624_v26 }
 0x3cf   :  { %v619_v29 = vmax.f32 %v617_v25, %v618_v27 }
 0x3d0   :  { %v626_v30 = vrot.slane %v625_v28, 1 }
 0x3d1   :  { %v620_v31 = vrot.slane %v619_v29, 1 }
 0x3d2   :  { %v627_v32 = vmax.f32 %v625_v28, %v626_v30 }
 0x3d3   :  { %v621_v33 = vmax.f32 %v619_v29, %v620_v31 }
 0x3d4   :  { %v629_v34 = vsub.f32 %v613_v19, %v627_v32 }
 0x3d5   :  { %v628_v35 = vsub.f32 %v608_v21, %v621_v33 }
 0x3d6   :  { %v632_v36 = vmul.f32 1.442695, %v629_v34 }
 0x3d7   :  { %v630_v37 = vmul.f32 1.442695, %v628_v35 }
 0x3d8   :  { %795 = vpow2.f32 %v632_v36 }
 0x3d9   :  { %797 = vpow2.f32 %v630_v37 }
 0x3e2   :  { %v796_v38 = vpop.eup %795 }
 0x3e3   :  { %v798_v39 = vpop.eup %797  ;;  %v640_v40 = vrot.slane %v796_v38, 4 }
 0x3e4   :  { %v634_v41 = vrot.slane %v798_v39, 4 }
 0x3e5   :  { %v641_v42 = vadd.f32 %v796_v38, %v640_v40 }
 0x3e6   :  { %v635_v43 = vadd.f32 %v798_v39, %v634_v41 }
 0x3e7   :  { %v642_v44 = vrot.slane %v641_v42, 2 }
 0x3e8   :  { %v636_v45 = vrot.slane %v635_v43, 2 }
 0x3e9   :  { %v643_v46 = vadd.f32 %v642_v44, %v641_v42 }
 0x3ea   :  { %v637_v47 = vadd.f32 %v636_v45, %v635_v43 }
 0x3eb   :  { %v644_v48 = vrot.slane %v643_v46, 1 }
 0x3ec   :  { %v638_v49 = vrot.slane %v637_v47, 1 }
 0x3ed   :  { %v645_v50 = vadd.f32 %v644_v48, %v643_v46 }
 0x3ee   :  { %v639_v51 = vadd.f32 %v638_v49, %v637_v47 }
 0x3ef   :  { %799 = vrcp.f32 %v645_v50 }
 0x3f0   :  { %801 = vrcp.f32 %v639_v51 }
 0x3f9   :  { %v800_v52 = vpop.eup %799 }
 0x3fa   :  { %v802_v53 = vpop.eup %801  ;;  %v649_v54 = vmul.f32 %v800_v52, %v796_v38 }
 0x3fb   :  { %v647_v55 = vmul.f32 %v802_v53, %v798_v39 }
 0x3fc   :  { %651 = vst [vmem:[#allocation2 + $0x8] sm:$0xff] %v649_v54 }
 0x3fd   :  { %650 = vst [vmem:[#allocation2] sm:$0xff] %v647_v55 }
 0x3fe   :  { %814 = shalt.err (!%p811_p4)
}
 0x3ff   :  { %s815_s1 = scalar_lea.hbm %s1042_s11, 256 }
 0x400   :  { %p816_p5 = scmp.ne.s32.totalorder %s1042_s11, %s815_s1  ;;  %p819_p6 = scmp.lt.u32.totalorder %s815_s1, %s1042_s11 }
 0x402   :  { %p821_p7 = pnand %p819_p6, %p816_p5 }
 0x404   :  { %824 = shalt.err (!%p821_p7)
}
 0x405   :  { %s829_s26 = smov 128   ;;  %s830_s0 = smov 8  }
 0x406   :  { %663 = dma.vmem_to_hbm [thread:$0]  %s658_s20, 256, %s1042_s11, [#allocation3], %s829_s26, %s829_s26, %s830_s0  }
 0x407   :  { %825 = dma.done.wait [#allocation3], 256  }
 0x408   :  { %826 = vsyncadd [#allocation3], 4294967040 }
 0x409   :  { %667 = vsyncpa [#allocation3], 1 }

</bundles_post_ra>
